<compile_context>
chip_gen: v5e
topology: v5e:2x2
jax: 0.10.0
libtpu: 0.0.40
codegen_flags: <defaults>
</compile_context>

<pallas_src>
import jax
import jax.numpy as jnp
import numpy as np
from jax.experimental import pallas as pl
from jax.experimental.pallas import tpu as pltpu


# ---------------------------------------------------------------------------
# Fused kernel: input projection for the chunk + serial LSTM recurrence.
# ---------------------------------------------------------------------------
def _lstm_fused_kernel(x_ref, wih_ref, bias_ref, whh_ref, out_ref,
                       xw_scr, h_scr, c_scr):
    """One grid step = one (batch-slab, time-chunk).

    x_ref   : (T, Bblk, I)   input chunk (matmul dtype)
    wih_ref : (I, 4H)        W_ih^T (resident)
    bias_ref: (1, 4H)        b_ih + b_hh (f32, resident)
    whh_ref : (H, 4H)        W_hh^T (resident)
    out_ref : (T, Bblk, H)   hidden states for this chunk (f32)
    xw_scr  : (T, Bblk, 4H)  f32 scratch for the fused input projection
    h_scr/c_scr : (Bblk, H)  f32 recurrent state carried across time chunks
    """
    s = pl.program_id(1)  # time-chunk index (innermost, sequential)

    @pl.when(s == 0)
    def _():
        h_scr[...] = jnp.zeros_like(h_scr)
        c_scr[...] = jnp.zeros_like(c_scr)

    T, Bblk, I = x_ref.shape
    H = h_scr.shape[1]
    G = 4 * H

    # ---- Fused "Phase 1": one chunk-wide MXU matmul (fills MXU rows) ----
    x2d = x_ref[...].reshape(T * Bblk, I)
    xw = jnp.dot(x2d, wih_ref[...], preferred_element_type=jnp.float32)
    xw_scr[...] = (xw + bias_ref[...]).reshape(T, Bblk, G)

    # ---- Loop invariants hoisted out of the serial per-step path ----
    lanes = jax.lax.broadcasted_iota(jnp.int32, (Bblk, G), 1)
    g_mask = (lanes >= 2 * H) & (lanes < 3 * H)
    # Single EUP pass per step: tanh(x) = 2*sigmoid(2x) - 1 on the g lanes.
    scale = jnp.where(g_mask, jnp.float32(2.0), jnp.float32(1.0))
    offset = scale - jnp.float32(1.0)

    hoist_whh = H <= 64                     # (H,4H) fits easily in vregs at small H
    whh = whh_ref[...] if hoist_whh else None

    def step(t, carry):
        h_prev, c_prev = carry
        w = whh if hoist_whh else whh_ref[...]   # stream from VMEM for large H
        gates = xw_scr[t] + jnp.dot(h_prev.astype(w.dtype), w,
                                    preferred_element_type=jnp.float32)
        sig = jax.nn.sigmoid(gates * scale)      # one full-width EUP pass
        acts = sig * scale - offset              # sigmoid on i/f/o, tanh on g

        i_g = acts[:, 0 * H:1 * H]
        f_g = acts[:, 1 * H:2 * H]
        g_g = acts[:, 2 * H:3 * H]
        o_g = acts[:, 3 * H:4 * H]

        c_new = f_g * c_prev + i_g * g_g
        h_new = o_g * jnp.tanh(c_new)
        out_ref[t] = h_new.astype(out_ref.dtype)
        return h_new, c_new

    h_last, c_last = jax.lax.fori_loop(
        0, T, step, (h_scr[...], c_scr[...]), unroll=min(T, 8))
    h_scr[...] = h_last
    c_scr[...] = c_last


# ---------------------------------------------------------------------------
# Wrapper
# ---------------------------------------------------------------------------
def lstm_encoder_pallas(x, w_ih, w_hh, b_ih, b_hh, *,
                        matmul_dtype=jnp.float32,
                        t_chunk=None, batch_block=None,
                        vmem_budget_bytes=24 << 20):
    """x: (S, B, I). w_ih: (4H, I), w_hh: (4H, H), b_ih/b_hh: (4H,).

    Returns encoded_sequence (S, B, H) == nn.LSTM(...)(x)[0] with zero init states.
    """
    S, B, I = x.shape
    H = w_hh.shape[1]
    G = 4 * H

    x = jnp.asarray(x, jnp.float32).astype(matmul_dtype)              # (S, B, I)
    w_ih_t = jnp.asarray(w_ih, jnp.float32).T.astype(matmul_dtype)    # (I, 4H)
    w_hh_t = jnp.asarray(w_hh, jnp.float32).T.astype(matmul_dtype)    # (H, 4H)
    bias = (jnp.asarray(b_ih, jnp.float32)
            + jnp.asarray(b_hh, jnp.float32)).reshape(1, G)

    # ---- batch sharding: give the "parallel" axis 2 entries for v7x megacore ----
    if batch_block is None:
        if B >= 16 and (B // 2) % 8 == 0:
            batch_block = B // 2
        else:
            batch_block = B
    assert B % batch_block == 0
    nb = B // batch_block

    x_item = jnp.dtype(matmul_dtype).itemsize

    # ---- VMEM-budgeted time-chunk selection ----
    resident = 2 * (I * G + G + H * G) * 4          # weights + bias (conservative f32, 2 bufs)
    fixed = resident + 2 * batch_block * H * 4 + (256 << 10)   # h/c scratch + slack
    per_t = (2 * batch_block * I * x_item           # x block, double-buffered
             + 2 * batch_block * H * 4              # out block, double-buffered
             + batch_block * G * 4)                 # xw scratch (single)
    if t_chunk is None:
        cap = max(1, (vmem_budget_bytes - fixed) // per_t)
        t_chunk = 1
        for cand in (1, 2, 4, 8, 16, 32, 64, 128):
            if cand <= min(S, cap) and S % cand == 0:
                t_chunk = cand
    assert S % t_chunk == 0
    ns = S // t_chunk

    vmem_limit = int(min(60 << 20, max(16 << 20, 2 * (fixed + per_t * t_chunk))))

    # Resident (constant-index) blocks: single-buffer them only where it matters
    # (large H); pl.Buffered(1) halves the resident-weight VMEM on v7x's 64 MiB.
    single_buffer_weights = H >= 128

    def _resident_spec(shape):
        if single_buffer_weights:
            return pl.BlockSpec(shape, lambda b, s: (0, 0),
                                pipeline_mode=pl.Buffered(1))
        return pl.BlockSpec(shape, lambda b, s: (0, 0))

    out = pl.pallas_call(
        _lstm_fused_kernel,
        out_shape=jax.ShapeDtypeStruct((S, B, H), jnp.float32),
        grid_spec=pltpu.PrefetchScalarGridSpec(
            num_scalar_prefetch=0,
            grid=(nb, ns),
            in_specs=[
                pl.BlockSpec((t_chunk, batch_block, I), lambda b, s: (s, b, 0)),
                _resident_spec((I, G)),          # W_ih^T (resident)
                _resident_spec((1, G)),          # fused bias (resident)
                _resident_spec((H, G)),          # W_hh^T (resident)
            ],
            out_specs=pl.BlockSpec((t_chunk, batch_block, H),
                                   lambda b, s: (s, b, 0)),
            scratch_shapes=[
                pltpu.VMEM((t_chunk, batch_block, G), jnp.float32),  # xw scratch
                pltpu.VMEM((batch_block, H), jnp.float32),           # h state
                pltpu.VMEM((batch_block, H), jnp.float32),           # c state
            ],
        ),
        compiler_params=pltpu.CompilerParams(
            # batch axis: independent recurrences (megacore-shardable on v7x);
            # time axis carries h/c through scratch -> must stay arbitrary.
            dimension_semantics=("parallel", "arbitrary"),
            vmem_limit_bytes=vmem_limit),
    )(x, w_ih_t, bias, w_hh_t)

    return out


# ---------------------------------------------------------------------------
# Pure-JAX reference matching torch.nn.LSTM forward (single layer, zero init).
# ---------------------------------------------------------------------------
def lstm_encoder_ref(x, w_ih, w_hh, b_ih, b_hh):
    S, B, I = x.shape
    H = w_hh.shape[1]
    w_ih_t = w_ih.T
    w_hh_t = w_hh.T
    bias = b_ih + b_hh

    def step(carry, x_t):
        h, c = carry
        gates = x_t @ w_ih_t + h @ w_hh_t + bias
        i_g = jax.nn.sigmoid(gates[:, 0 * H:1 * H])
        f_g = jax.nn.sigmoid(gates[:, 1 * H:2 * H])
        g_g = jnp.tanh(gates[:, 2 * H:3 * H])
        o_g = jax.nn.sigmoid(gates[:, 3 * H:4 * H])
        c_new = f_g * c + i_g * g_g
        h_new = o_g * jnp.tanh(c_new)
        return (h_new, c_new), h_new

    h0 = jnp.zeros((B, H), jnp.float32)
    c0 = jnp.zeros((B, H), jnp.float32)
    _, hs = jax.lax.scan(step, (h0, c0), x)
    return hs


if __name__ == "__main__":
    SEQ, BATCH, INPUT_SIZE, HIDDEN_SIZE = 8, 8, 16, 32

    key = jax.random.PRNGKey(0)
    k_x, k_wih, k_whh, k_bih, k_bhh = jax.random.split(key, 5)

    bound = 1.0 / np.sqrt(HIDDEN_SIZE)
    x = jax.random.normal(k_x, (SEQ, BATCH, INPUT_SIZE), jnp.float32)
    w_ih = jax.random.uniform(k_wih, (4 * HIDDEN_SIZE, INPUT_SIZE), jnp.float32,
                              -bound, bound)
    w_hh = jax.random.uniform(k_whh, (4 * HIDDEN_SIZE, HIDDEN_SIZE), jnp.float32,
                              -bound, bound)
    b_ih = jax.random.uniform(k_bih, (4 * HIDDEN_SIZE,), jnp.float32, -bound, bound)
    b_hh = jax.random.uniform(k_bhh, (4 * HIDDEN_SIZE,), jnp.float32, -bound, bound)

    ref = lstm_encoder_ref(x, w_ih, w_hh, b_ih, b_hh)

    # f32 path
    out = jax.block_until_ready(lstm_encoder_pallas(x, w_ih, w_hh, b_ih, b_hh))
    np.testing.assert_allclose(np.asarray(out), np.asarray(ref),
                               atol=2e-5, rtol=2e-5)

    # bf16-MXU path (valid on v5e/v6e/v7x): bf16 matmul inputs, f32 accumulation,
    # f32 gate/state math.  Looser tolerance reflects bf16 input rounding at S=8.
    out_bf16 = jax.block_until_ready(
        lstm_encoder_pallas(x, w_ih, w_hh, b_ih, b_hh,
                            matmul_dtype=jnp.bfloat16))
    np.testing.assert_allclose(np.asarray(out_bf16), np.asarray(ref),
                               atol=5e-2, rtol=0)

    print("KERNEL_OK")
</pallas_src>

<mosaic_0001>
module attributes {stable_mosaic.version = 11 : i64} {
  func.func @_lstm_fused_kernel(%arg0: i32, %arg1: i32, %arg2: memref<8x8x16xf32, #tpu.memory_space<vmem>>, %arg3: memref<16x128xf32, #tpu.memory_space<vmem>>, %arg4: memref<1x128xf32, #tpu.memory_space<vmem>>, %arg5: memref<32x128xf32, #tpu.memory_space<vmem>>, %arg6: memref<8x8x32xf32, #tpu.memory_space<vmem>>, %arg7: memref<8x8x128xf32, #tpu.memory_space<vmem>>, %arg8: memref<8x32xf32, #tpu.memory_space<vmem>>, %arg9: memref<8x32xf32, #tpu.memory_space<vmem>>) attributes {dimension_semantics = [#tpu.dimension_semantics<parallel>, #tpu.dimension_semantics<arbitrary>], iteration_bounds = array<i64: 1, 1>, scalar_prefetch = 0 : i64, scratch_operands = 3 : i64, tpu.core_type = #tpu.core_type<tc>, window_params = [{transform_indices = @transform_0, window_bounds = array<i64: 8, 8, 16>}, {pipeline_mode = #tpu.pipeline_mode<synchronous>, transform_indices = @transform_1, window_bounds = array<i64: 16, 128>}, {pipeline_mode = #tpu.pipeline_mode<synchronous>, transform_indices = @transform_2, window_bounds = array<i64: 1, 128>}, {pipeline_mode = #tpu.pipeline_mode<synchronous>, transform_indices = @transform_3, window_bounds = array<i64: 32, 128>}, {transform_indices = @transform_4, window_bounds = array<i64: 8, 8, 32>}]} {
    %c0_i32 = arith.constant 0 : i32
    %0 = arith.cmpi eq, %arg1, %c0_i32 : i32
    %1 = arith.extui %0 : i1 to i32
    %c0_i32_0 = arith.constant 0 : i32
    %2 = arith.cmpi ne, %1, %c0_i32_0 : i32
    scf.if %2 {
      %cst_72 = arith.constant 0.000000e+00 : f32
      %236 = vector.broadcast %cst_72 : f32 to vector<8x32xf32>
      %c0_73 = arith.constant 0 : index
      %c0_74 = arith.constant 0 : index
      %237 = vector.load %arg8[%c0_73, %c0_74] : memref<8x32xf32, #tpu.memory_space<vmem>>, vector<8x32xf32>
      tpu.vector_store %arg8[%c0_73, %c0_74], %236 {strides = array<i32>} : memref<8x32xf32, #tpu.memory_space<vmem>>, vector<8x32xf32>,
      %cst_75 = arith.constant 0.000000e+00 : f32
      %238 = vector.broadcast %cst_75 : f32 to vector<8x32xf32>
      %c0_76 = arith.constant 0 : index
      %c0_77 = arith.constant 0 : index
      %239 = vector.load %arg9[%c0_76, %c0_77] : memref<8x32xf32, #tpu.memory_space<vmem>>, vector<8x32xf32>
      tpu.vector_store %arg9[%c0_76, %c0_77], %238 {strides = array<i32>} : memref<8x32xf32, #tpu.memory_space<vmem>>, vector<8x32xf32>,
    } else {
    }
    %c0 = arith.constant 0 : index
    %c0_1 = arith.constant 0 : index
    %c0_2 = arith.constant 0 : index
    %3 = vector.load %arg2[%c0, %c0_1, %c0_2] : memref<8x8x16xf32, #tpu.memory_space<vmem>>, vector<8x8x16xf32>
    %4 = vector.shape_cast %3 : vector<8x8x16xf32> to vector<64x16xf32>
    %c0_3 = arith.constant 0 : index
    %c0_4 = arith.constant 0 : index
    %5 = vector.load %arg3[%c0_3, %c0_4] : memref<16x128xf32, #tpu.memory_space<vmem>>, vector<16x128xf32>
    %cst = arith.constant dense<0.000000e+00> : vector<64x128xf32>
    %6 = tpu.matmul %4, %5, %cst {dimension_numbers = #tpu.dot_dimension_numbers<[1], [0], [0], [1], [0, 0, 1, 1], [], []>} : vector<64x16xf32>, vector<16x128xf32>, vector<64x128xf32> -> vector<64x128xf32>
    %c0_5 = arith.constant 0 : index
    %c0_6 = arith.constant 0 : index
    %7 = vector.load %arg4[%c0_5, %c0_6] : memref<1x128xf32, #tpu.memory_space<vmem>>, vector<1x128xf32>
    %8 = vector.broadcast %7 : vector<1x128xf32> to vector<64x128xf32>
    %9 = arith.addf %6, %8 : vector<64x128xf32>
    %10 = vector.shape_cast %9 : vector<64x128xf32> to vector<8x8x128xf32>
    %c0_7 = arith.constant 0 : index
    %c0_8 = arith.constant 0 : index
    %c0_9 = arith.constant 0 : index
    %11 = vector.load %arg7[%c0_7, %c0_8, %c0_9] : memref<8x8x128xf32, #tpu.memory_space<vmem>>, vector<8x8x128xf32>
    tpu.vector_store %arg7[%c0_7, %c0_8, %c0_9], %10 {strides = array<i32>} : memref<8x8x128xf32, #tpu.memory_space<vmem>>, vector<8x8x128xf32>,
    %12 = tpu.iota {dimensions = array<i32: 1>} : vector<8x128xi32>
    %c64_i32 = arith.constant 64 : i32
    %13 = vector.broadcast %c64_i32 : i32 to vector<8x128xi32>
    %14 = arith.cmpi sge, %12, %13 : vector<8x128xi32>
    %c96_i32 = arith.constant 96 : i32
    %15 = vector.broadcast %c96_i32 : i32 to vector<8x128xi32>
    %16 = arith.cmpi slt, %12, %15 : vector<8x128xi32>
    %17 = arith.andi %14, %16 : vector<8x128xi1>
    %cst_10 = arith.constant 2.000000e+00 : f32
    %cst_11 = arith.constant 1.000000e+00 : f32
    %18 = vector.broadcast %cst_10 : f32 to vector<8x128xf32>
    %19 = vector.broadcast %cst_11 : f32 to vector<8x128xf32>
    %20 = arith.select %17, %18, %19 : vector<8x128xi1>, vector<8x128xf32>
    %cst_12 = arith.constant 1.000000e+00 : f32
    %21 = vector.broadcast %cst_12 : f32 to vector<8x128xf32>
    %22 = arith.subf %20, %21 : vector<8x128xf32>
    %c0_13 = arith.constant 0 : index
    %c0_14 = arith.constant 0 : index
    %23 = vector.load %arg5[%c0_13, %c0_14] : memref<32x128xf32, #tpu.memory_space<vmem>>, vector<32x128xf32>
    %c0_15 = arith.constant 0 : index
    %c0_16 = arith.constant 0 : index
    %24 = vector.load %arg8[%c0_15, %c0_16] : memref<8x32xf32, #tpu.memory_space<vmem>>, vector<8x32xf32>
    %c0_17 = arith.constant 0 : index
    %c0_18 = arith.constant 0 : index
    %25 = vector.load %arg9[%c0_17, %c0_18] : memref<8x32xf32, #tpu.memory_space<vmem>>, vector<8x32xf32>
    %c0_i32_19 = arith.constant 0 : i32
    %26 = arith.index_cast %c0_i32_19 : i32 to index
    %c0_20 = arith.constant 0 : index
    %c0_21 = arith.constant 0 : index
    %27 = vector.load %arg7[%26, %c0_20, %c0_21] : memref<8x8x128xf32, #tpu.memory_space<vmem>>, vector<1x8x128xf32>
    %28 = vector.shape_cast %27 : vector<1x8x128xf32> to vector<8x128xf32>
    %cst_22 = arith.constant dense<0.000000e+00> : vector<8x128xf32>
    %29 = tpu.matmul %24, %23, %cst_22 {dimension_numbers = #tpu.dot_dimension_numbers<[1], [0], [0], [1], [0, 0, 1, 1], [], []>} : vector<8x32xf32>, vector<32x128xf32>, vector<8x128xf32> -> vector<8x128xf32>
    %30 = arith.addf %28, %29 : vector<8x128xf32>
    %31 = arith.mulf %30, %20 : vector<8x128xf32>
    %32 = arith.negf %31 : vector<8x128xf32>
    %33 = math.exp %32 : vector<8x128xf32>
    %cst_23 = arith.constant 1.000000e+00 : f32
    %34 = vector.broadcast %cst_23 : f32 to vector<8x128xf32>
    %35 = arith.addf %34, %33 : vector<8x128xf32>
    %36 = arith.divf %34, %35 : vector<8x128xf32>
    %37 = arith.mulf %36, %20 : vector<8x128xf32>
    %38 = arith.subf %37, %22 : vector<8x128xf32>
    %39 = vector.extract_strided_slice %38 {offsets = [0, 0], sizes = [8, 32], strides = [1, 1]} : vector<8x128xf32> to vector<8x32xf32>
    %40 = vector.extract_strided_slice %38 {offsets = [0, 32], sizes = [8, 32], strides = [1, 1]} : vector<8x128xf32> to vector<8x32xf32>
    %41 = vector.extract_strided_slice %38 {offsets = [0, 64], sizes = [8, 32], strides = [1, 1]} : vector<8x128xf32> to vector<8x32xf32>
    %42 = vector.extract_strided_slice %38 {offsets = [0, 96], sizes = [8, 32], strides = [1, 1]} : vector<8x128xf32> to vector<8x32xf32>
    %43 = arith.mulf %40, %25 : vector<8x32xf32>
    %44 = arith.mulf %39, %41 : vector<8x32xf32>
    %45 = arith.addf %43, %44 : vector<8x32xf32>
    %46 = math.tanh %45 : vector<8x32xf32>
    %47 = arith.mulf %42, %46 : vector<8x32xf32>
    %48 = arith.index_cast %c0_i32_19 : i32 to index
    %c0_24 = arith.constant 0 : index
    %c0_25 = arith.constant 0 : index
    %49 = vector.load %arg6[%48, %c0_24, %c0_25] : memref<8x8x32xf32, #tpu.memory_space<vmem>>, vector<1x8x32xf32>
    %50 = vector.shape_cast %49 : vector<1x8x32xf32> to vector<8x32xf32>
    %51 = vector.shape_cast %47 : vector<8x32xf32> to vector<1x8x32xf32>
    tpu.vector_store %arg6[%48, %c0_24, %c0_25], %51 {strides = array<i32>} : memref<8x8x32xf32, #tpu.memory_space<vmem>>, vector<1x8x32xf32>,
    %c1_i32 = arith.constant 1 : i32
    %52 = arith.index_cast %c1_i32 : i32 to index
    %c0_26 = arith.constant 0 : index
    %c0_27 = arith.constant 0 : index
    %53 = vector.load %arg7[%52, %c0_26, %c0_27] : memref<8x8x128xf32, #tpu.memory_space<vmem>>, vector<1x8x128xf32>
    %54 = vector.shape_cast %53 : vector<1x8x128xf32> to vector<8x128xf32>
    %cst_28 = arith.constant dense<0.000000e+00> : vector<8x128xf32>
    %55 = tpu.matmul %47, %23, %cst_28 {dimension_numbers = #tpu.dot_dimension_numbers<[1], [0], [0], [1], [0, 0, 1, 1], [], []>} : vector<8x32xf32>, vector<32x128xf32>, vector<8x128xf32> -> vector<8x128xf32>
    %56 = arith.addf %54, %55 : vector<8x128xf32>
    %57 = arith.mulf %56, %20 : vector<8x128xf32>
    %58 = arith.negf %57 : vector<8x128xf32>
    %59 = math.exp %58 : vector<8x128xf32>
    %cst_29 = arith.constant 1.000000e+00 : f32
    %60 = vector.broadcast %cst_29 : f32 to vector<8x128xf32>
    %61 = arith.addf %60, %59 : vector<8x128xf32>
    %62 = arith.divf %60, %61 : vector<8x128xf32>
    %63 = arith.mulf %62, %20 : vector<8x128xf32>
    %64 = arith.subf %63, %22 : vector<8x128xf32>
    %65 = vector.extract_strided_slice %64 {offsets = [0, 0], sizes = [8, 32], strides = [1, 1]} : vector<8x128xf32> to vector<8x32xf32>
    %66 = vector.extract_strided_slice %64 {offsets = [0, 32], sizes = [8, 32], strides = [1, 1]} : vector<8x128xf32> to vector<8x32xf32>
    %67 = vector.extract_strided_slice %64 {offsets = [0, 64], sizes = [8, 32], strides = [1, 1]} : vector<8x128xf32> to vector<8x32xf32>
    %68 = vector.extract_strided_slice %64 {offsets = [0, 96], sizes = [8, 32], strides = [1, 1]} : vector<8x128xf32> to vector<8x32xf32>
    %69 = arith.mulf %66, %45 : vector<8x32xf32>
    %70 = arith.mulf %65, %67 : vector<8x32xf32>
    %71 = arith.addf %69, %70 : vector<8x32xf32>
    %72 = math.tanh %71 : vector<8x32xf32>
    %73 = arith.mulf %68, %72 : vector<8x32xf32>
    %74 = arith.index_cast %c1_i32 : i32 to index
    %c0_30 = arith.constant 0 : index
    %c0_31 = arith.constant 0 : index
    %75 = vector.load %arg6[%74, %c0_30, %c0_31] : memref<8x8x32xf32, #tpu.memory_space<vmem>>, vector<1x8x32xf32>
    %76 = vector.shape_cast %75 : vector<1x8x32xf32> to vector<8x32xf32>
    %77 = vector.shape_cast %73 : vector<8x32xf32> to vector<1x8x32xf32>
    tpu.vector_store %arg6[%74, %c0_30, %c0_31], %77 {strides = array<i32>} : memref<8x8x32xf32, #tpu.memory_space<vmem>>, vector<1x8x32xf32>,
    %c2_i32 = arith.constant 2 : i32
    %78 = arith.index_cast %c2_i32 : i32 to index
    %c0_32 = arith.constant 0 : index
    %c0_33 = arith.constant 0 : index
    %79 = vector.load %arg7[%78, %c0_32, %c0_33] : memref<8x8x128xf32, #tpu.memory_space<vmem>>, vector<1x8x128xf32>
    %80 = vector.shape_cast %79 : vector<1x8x128xf32> to vector<8x128xf32>
    %cst_34 = arith.constant dense<0.000000e+00> : vector<8x128xf32>
    %81 = tpu.matmul %73, %23, %cst_34 {dimension_numbers = #tpu.dot_dimension_numbers<[1], [0], [0], [1], [0, 0, 1, 1], [], []>} : vector<8x32xf32>, vector<32x128xf32>, vector<8x128xf32> -> vector<8x128xf32>
    %82 = arith.addf %80, %81 : vector<8x128xf32>
    %83 = arith.mulf %82, %20 : vector<8x128xf32>
    %84 = arith.negf %83 : vector<8x128xf32>
    %85 = math.exp %84 : vector<8x128xf32>
    %cst_35 = arith.constant 1.000000e+00 : f32
    %86 = vector.broadcast %cst_35 : f32 to vector<8x128xf32>
    %87 = arith.addf %86, %85 : vector<8x128xf32>
    %88 = arith.divf %86, %87 : vector<8x128xf32>
    %89 = arith.mulf %88, %20 : vector<8x128xf32>
    %90 = arith.subf %89, %22 : vector<8x128xf32>
    %91 = vector.extract_strided_slice %90 {offsets = [0, 0], sizes = [8, 32], strides = [1, 1]} : vector<8x128xf32> to vector<8x32xf32>
    %92 = vector.extract_strided_slice %90 {offsets = [0, 32], sizes = [8, 32], strides = [1, 1]} : vector<8x128xf32> to vector<8x32xf32>
    %93 = vector.extract_strided_slice %90 {offsets = [0, 64], sizes = [8, 32], strides = [1, 1]} : vector<8x128xf32> to vector<8x32xf32>
    %94 = vector.extract_strided_slice %90 {offsets = [0, 96], sizes = [8, 32], strides = [1, 1]} : vector<8x128xf32> to vector<8x32xf32>
    %95 = arith.mulf %92, %71 : vector<8x32xf32>
    %96 = arith.mulf %91, %93 : vector<8x32xf32>
    %97 = arith.addf %95, %96 : vector<8x32xf32>
    %98 = math.tanh %97 : vector<8x32xf32>
    %99 = arith.mulf %94, %98 : vector<8x32xf32>
    %100 = arith.index_cast %c2_i32 : i32 to index
    %c0_36 = arith.constant 0 : index
    %c0_37 = arith.constant 0 : index
    %101 = vector.load %arg6[%100, %c0_36, %c0_37] : memref<8x8x32xf32, #tpu.memory_space<vmem>>, vector<1x8x32xf32>
    %102 = vector.shape_cast %101 : vector<1x8x32xf32> to vector<8x32xf32>
    %103 = vector.shape_cast %99 : vector<8x32xf32> to vector<1x8x32xf32>
    tpu.vector_store %arg6[%100, %c0_36, %c0_37], %103 {strides = array<i32>} : memref<8x8x32xf32, #tpu.memory_space<vmem>>, vector<1x8x32xf32>,
    %c3_i32 = arith.constant 3 : i32
    %104 = arith.index_cast %c3_i32 : i32 to index
    %c0_38 = arith.constant 0 : index
    %c0_39 = arith.constant 0 : index
    %105 = vector.load %arg7[%104, %c0_38, %c0_39] : memref<8x8x128xf32, #tpu.memory_space<vmem>>, vector<1x8x128xf32>
    %106 = vector.shape_cast %105 : vector<1x8x128xf32> to vector<8x128xf32>
    %cst_40 = arith.constant dense<0.000000e+00> : vector<8x128xf32>
    %107 = tpu.matmul %99, %23, %cst_40 {dimension_numbers = #tpu.dot_dimension_numbers<[1], [0], [0], [1], [0, 0, 1, 1], [], []>} : vector<8x32xf32>, vector<32x128xf32>, vector<8x128xf32> -> vector<8x128xf32>
    %108 = arith.addf %106, %107 : vector<8x128xf32>
    %109 = arith.mulf %108, %20 : vector<8x128xf32>
    %110 = arith.negf %109 : vector<8x128xf32>
    %111 = math.exp %110 : vector<8x128xf32>
    %cst_41 = arith.constant 1.000000e+00 : f32
    %112 = vector.broadcast %cst_41 : f32 to vector<8x128xf32>
    %113 = arith.addf %112, %111 : vector<8x128xf32>
    %114 = arith.divf %112, %113 : vector<8x128xf32>
    %115 = arith.mulf %114, %20 : vector<8x128xf32>
    %116 = arith.subf %115, %22 : vector<8x128xf32>
    %117 = vector.extract_strided_slice %116 {offsets = [0, 0], sizes = [8, 32], strides = [1, 1]} : vector<8x128xf32> to vector<8x32xf32>
    %118 = vector.extract_strided_slice %116 {offsets = [0, 32], sizes = [8, 32], strides = [1, 1]} : vector<8x128xf32> to vector<8x32xf32>
    %119 = vector.extract_strided_slice %116 {offsets = [0, 64], sizes = [8, 32], strides = [1, 1]} : vector<8x128xf32> to vector<8x32xf32>
    %120 = vector.extract_strided_slice %116 {offsets = [0, 96], sizes = [8, 32], strides = [1, 1]} : vector<8x128xf32> to vector<8x32xf32>
    %121 = arith.mulf %118, %97 : vector<8x32xf32>
    %122 = arith.mulf %117, %119 : vector<8x32xf32>
    %123 = arith.addf %121, %122 : vector<8x32xf32>
    %124 = math.tanh %123 : vector<8x32xf32>
    %125 = arith.mulf %120, %124 : vector<8x32xf32>
    %126 = arith.index_cast %c3_i32 : i32 to index
    %c0_42 = arith.constant 0 : index
    %c0_43 = arith.constant 0 : index
    %127 = vector.load %arg6[%126, %c0_42, %c0_43] : memref<8x8x32xf32, #tpu.memory_space<vmem>>, vector<1x8x32xf32>
    %128 = vector.shape_cast %127 : vector<1x8x32xf32> to vector<8x32xf32>
    %129 = vector.shape_cast %125 : vector<8x32xf32> to vector<1x8x32xf32>
    tpu.vector_store %arg6[%126, %c0_42, %c0_43], %129 {strides = array<i32>} : memref<8x8x32xf32, #tpu.memory_space<vmem>>, vector<1x8x32xf32>,
    %c4_i32 = arith.constant 4 : i32
    %130 = arith.index_cast %c4_i32 : i32 to index
    %c0_44 = arith.constant 0 : index
    %c0_45 = arith.constant 0 : index
    %131 = vector.load %arg7[%130, %c0_44, %c0_45] : memref<8x8x128xf32, #tpu.memory_space<vmem>>, vector<1x8x128xf32>
    %132 = vector.shape_cast %131 : vector<1x8x128xf32> to vector<8x128xf32>
    %cst_46 = arith.constant dense<0.000000e+00> : vector<8x128xf32>
    %133 = tpu.matmul %125, %23, %cst_46 {dimension_numbers = #tpu.dot_dimension_numbers<[1], [0], [0], [1], [0, 0, 1, 1], [], []>} : vector<8x32xf32>, vector<32x128xf32>, vector<8x128xf32> -> vector<8x128xf32>
    %134 = arith.addf %132, %133 : vector<8x128xf32>
    %135 = arith.mulf %134, %20 : vector<8x128xf32>
    %136 = arith.negf %135 : vector<8x128xf32>
    %137 = math.exp %136 : vector<8x128xf32>
    %cst_47 = arith.constant 1.000000e+00 : f32
    %138 = vector.broadcast %cst_47 : f32 to vector<8x128xf32>
    %139 = arith.addf %138, %137 : vector<8x128xf32>
    %140 = arith.divf %138, %139 : vector<8x128xf32>
    %141 = arith.mulf %140, %20 : vector<8x128xf32>
    %142 = arith.subf %141, %22 : vector<8x128xf32>
    %143 = vector.extract_strided_slice %142 {offsets = [0, 0], sizes = [8, 32], strides = [1, 1]} : vector<8x128xf32> to vector<8x32xf32>
    %144 = vector.extract_strided_slice %142 {offsets = [0, 32], sizes = [8, 32], strides = [1, 1]} : vector<8x128xf32> to vector<8x32xf32>
    %145 = vector.extract_strided_slice %142 {offsets = [0, 64], sizes = [8, 32], strides = [1, 1]} : vector<8x128xf32> to vector<8x32xf32>
    %146 = vector.extract_strided_slice %142 {offsets = [0, 96], sizes = [8, 32], strides = [1, 1]} : vector<8x128xf32> to vector<8x32xf32>
    %147 = arith.mulf %144, %123 : vector<8x32xf32>
    %148 = arith.mulf %143, %145 : vector<8x32xf32>
    %149 = arith.addf %147, %148 : vector<8x32xf32>
    %150 = math.tanh %149 : vector<8x32xf32>
    %151 = arith.mulf %146, %150 : vector<8x32xf32>
    %152 = arith.index_cast %c4_i32 : i32 to index
    %c0_48 = arith.constant 0 : index
    %c0_49 = arith.constant 0 : index
    %153 = vector.load %arg6[%152, %c0_48, %c0_49] : memref<8x8x32xf32, #tpu.memory_space<vmem>>, vector<1x8x32xf32>
    %154 = vector.shape_cast %153 : vector<1x8x32xf32> to vector<8x32xf32>
    %155 = vector.shape_cast %151 : vector<8x32xf32> to vector<1x8x32xf32>
    tpu.vector_store %arg6[%152, %c0_48, %c0_49], %155 {strides = array<i32>} : memref<8x8x32xf32, #tpu.memory_space<vmem>>, vector<1x8x32xf32>,
    %c5_i32 = arith.constant 5 : i32
    %156 = arith.index_cast %c5_i32 : i32 to index
    %c0_50 = arith.constant 0 : index
    %c0_51 = arith.constant 0 : index
    %157 = vector.load %arg7[%156, %c0_50, %c0_51] : memref<8x8x128xf32, #tpu.memory_space<vmem>>, vector<1x8x128xf32>
    %158 = vector.shape_cast %157 : vector<1x8x128xf32> to vector<8x128xf32>
    %cst_52 = arith.constant dense<0.000000e+00> : vector<8x128xf32>
    %159 = tpu.matmul %151, %23, %cst_52 {dimension_numbers = #tpu.dot_dimension_numbers<[1], [0], [0], [1], [0, 0, 1, 1], [], []>} : vector<8x32xf32>, vector<32x128xf32>, vector<8x128xf32> -> vector<8x128xf32>
    %160 = arith.addf %158, %159 : vector<8x128xf32>
    %161 = arith.mulf %160, %20 : vector<8x128xf32>
    %162 = arith.negf %161 : vector<8x128xf32>
    %163 = math.exp %162 : vector<8x128xf32>
    %cst_53 = arith.constant 1.000000e+00 : f32
    %164 = vector.broadcast %cst_53 : f32 to vector<8x128xf32>
    %165 = arith.addf %164, %163 : vector<8x128xf32>
    %166 = arith.divf %164, %165 : vector<8x128xf32>
    %167 = arith.mulf %166, %20 : vector<8x128xf32>
    %168 = arith.subf %167, %22 : vector<8x128xf32>
    %169 = vector.extract_strided_slice %168 {offsets = [0, 0], sizes = [8, 32], strides = [1, 1]} : vector<8x128xf32> to vector<8x32xf32>
    %170 = vector.extract_strided_slice %168 {offsets = [0, 32], sizes = [8, 32], strides = [1, 1]} : vector<8x128xf32> to vector<8x32xf32>
    %171 = vector.extract_strided_slice %168 {offsets = [0, 64], sizes = [8, 32], strides = [1, 1]} : vector<8x128xf32> to vector<8x32xf32>
    %172 = vector.extract_strided_slice %168 {offsets = [0, 96], sizes = [8, 32], strides = [1, 1]} : vector<8x128xf32> to vector<8x32xf32>
    %173 = arith.mulf %170, %149 : vector<8x32xf32>
    %174 = arith.mulf %169, %171 : vector<8x32xf32>
    %175 = arith.addf %173, %174 : vector<8x32xf32>
    %176 = math.tanh %175 : vector<8x32xf32>
    %177 = arith.mulf %172, %176 : vector<8x32xf32>
    %178 = arith.index_cast %c5_i32 : i32 to index
    %c0_54 = arith.constant 0 : index
    %c0_55 = arith.constant 0 : index
    %179 = vector.load %arg6[%178, %c0_54, %c0_55] : memref<8x8x32xf32, #tpu.memory_space<vmem>>, vector<1x8x32xf32>
    %180 = vector.shape_cast %179 : vector<1x8x32xf32> to vector<8x32xf32>
    %181 = vector.shape_cast %177 : vector<8x32xf32> to vector<1x8x32xf32>
    tpu.vector_store %arg6[%178, %c0_54, %c0_55], %181 {strides = array<i32>} : memref<8x8x32xf32, #tpu.memory_space<vmem>>, vector<1x8x32xf32>,
    %c6_i32 = arith.constant 6 : i32
    %182 = arith.index_cast %c6_i32 : i32 to index
    %c0_56 = arith.constant 0 : index
    %c0_57 = arith.constant 0 : index
    %183 = vector.load %arg7[%182, %c0_56, %c0_57] : memref<8x8x128xf32, #tpu.memory_space<vmem>>, vector<1x8x128xf32>
    %184 = vector.shape_cast %183 : vector<1x8x128xf32> to vector<8x128xf32>
    %cst_58 = arith.constant dense<0.000000e+00> : vector<8x128xf32>
    %185 = tpu.matmul %177, %23, %cst_58 {dimension_numbers = #tpu.dot_dimension_numbers<[1], [0], [0], [1], [0, 0, 1, 1], [], []>} : vector<8x32xf32>, vector<32x128xf32>, vector<8x128xf32> -> vector<8x128xf32>
    %186 = arith.addf %184, %185 : vector<8x128xf32>
    %187 = arith.mulf %186, %20 : vector<8x128xf32>
    %188 = arith.negf %187 : vector<8x128xf32>
    %189 = math.exp %188 : vector<8x128xf32>
    %cst_59 = arith.constant 1.000000e+00 : f32
    %190 = vector.broadcast %cst_59 : f32 to vector<8x128xf32>
    %191 = arith.addf %190, %189 : vector<8x128xf32>
    %192 = arith.divf %190, %191 : vector<8x128xf32>
    %193 = arith.mulf %192, %20 : vector<8x128xf32>
    %194 = arith.subf %193, %22 : vector<8x128xf32>
    %195 = vector.extract_strided_slice %194 {offsets = [0, 0], sizes = [8, 32], strides = [1, 1]} : vector<8x128xf32> to vector<8x32xf32>
    %196 = vector.extract_strided_slice %194 {offsets = [0, 32], sizes = [8, 32], strides = [1, 1]} : vector<8x128xf32> to vector<8x32xf32>
    %197 = vector.extract_strided_slice %194 {offsets = [0, 64], sizes = [8, 32], strides = [1, 1]} : vector<8x128xf32> to vector<8x32xf32>
    %198 = vector.extract_strided_slice %194 {offsets = [0, 96], sizes = [8, 32], strides = [1, 1]} : vector<8x128xf32> to vector<8x32xf32>
    %199 = arith.mulf %196, %175 : vector<8x32xf32>
    %200 = arith.mulf %195, %197 : vector<8x32xf32>
    %201 = arith.addf %199, %200 : vector<8x32xf32>
    %202 = math.tanh %201 : vector<8x32xf32>
    %203 = arith.mulf %198, %202 : vector<8x32xf32>
    %204 = arith.index_cast %c6_i32 : i32 to index
    %c0_60 = arith.constant 0 : index
    %c0_61 = arith.constant 0 : index
    %205 = vector.load %arg6[%204, %c0_60, %c0_61] : memref<8x8x32xf32, #tpu.memory_space<vmem>>, vector<1x8x32xf32>
    %206 = vector.shape_cast %205 : vector<1x8x32xf32> to vector<8x32xf32>
    %207 = vector.shape_cast %203 : vector<8x32xf32> to vector<1x8x32xf32>
    tpu.vector_store %arg6[%204, %c0_60, %c0_61], %207 {strides = array<i32>} : memref<8x8x32xf32, #tpu.memory_space<vmem>>, vector<1x8x32xf32>,
    %c7_i32 = arith.constant 7 : i32
    %208 = arith.index_cast %c7_i32 : i32 to index
    %c0_62 = arith.constant 0 : index
    %c0_63 = arith.constant 0 : index
    %209 = vector.load %arg7[%208, %c0_62, %c0_63] : memref<8x8x128xf32, #tpu.memory_space<vmem>>, vector<1x8x128xf32>
    %210 = vector.shape_cast %209 : vector<1x8x128xf32> to vector<8x128xf32>
    %cst_64 = arith.constant dense<0.000000e+00> : vector<8x128xf32>
    %211 = tpu.matmul %203, %23, %cst_64 {dimension_numbers = #tpu.dot_dimension_numbers<[1], [0], [0], [1], [0, 0, 1, 1], [], []>} : vector<8x32xf32>, vector<32x128xf32>, vector<8x128xf32> -> vector<8x128xf32>
    %212 = arith.addf %210, %211 : vector<8x128xf32>
    %213 = arith.mulf %212, %20 : vector<8x128xf32>
    %214 = arith.negf %213 : vector<8x128xf32>
    %215 = math.exp %214 : vector<8x128xf32>
    %cst_65 = arith.constant 1.000000e+00 : f32
    %216 = vector.broadcast %cst_65 : f32 to vector<8x128xf32>
    %217 = arith.addf %216, %215 : vector<8x128xf32>
    %218 = arith.divf %216, %217 : vector<8x128xf32>
    %219 = arith.mulf %218, %20 : vector<8x128xf32>
    %220 = arith.subf %219, %22 : vector<8x128xf32>
    %221 = vector.extract_strided_slice %220 {offsets = [0, 0], sizes = [8, 32], strides = [1, 1]} : vector<8x128xf32> to vector<8x32xf32>
    %222 = vector.extract_strided_slice %220 {offsets = [0, 32], sizes = [8, 32], strides = [1, 1]} : vector<8x128xf32> to vector<8x32xf32>
    %223 = vector.extract_strided_slice %220 {offsets = [0, 64], sizes = [8, 32], strides = [1, 1]} : vector<8x128xf32> to vector<8x32xf32>
    %224 = vector.extract_strided_slice %220 {offsets = [0, 96], sizes = [8, 32], strides = [1, 1]} : vector<8x128xf32> to vector<8x32xf32>
    %225 = arith.mulf %222, %201 : vector<8x32xf32>
    %226 = arith.mulf %221, %223 : vector<8x32xf32>
    %227 = arith.addf %225, %226 : vector<8x32xf32>
    %228 = math.tanh %227 : vector<8x32xf32>
    %229 = arith.mulf %224, %228 : vector<8x32xf32>
    %230 = arith.index_cast %c7_i32 : i32 to index
    %c0_66 = arith.constant 0 : index
    %c0_67 = arith.constant 0 : index
    %231 = vector.load %arg6[%230, %c0_66, %c0_67] : memref<8x8x32xf32, #tpu.memory_space<vmem>>, vector<1x8x32xf32>
    %232 = vector.shape_cast %231 : vector<1x8x32xf32> to vector<8x32xf32>
    %233 = vector.shape_cast %229 : vector<8x32xf32> to vector<1x8x32xf32>
    tpu.vector_store %arg6[%230, %c0_66, %c0_67], %233 {strides = array<i32>} : memref<8x8x32xf32, #tpu.memory_space<vmem>>, vector<1x8x32xf32>,
    %c8_i32 = arith.constant 8 : i32
    %c0_68 = arith.constant 0 : index
    %c0_69 = arith.constant 0 : index
    %234 = vector.load %arg8[%c0_68, %c0_69] : memref<8x32xf32, #tpu.memory_space<vmem>>, vector<8x32xf32>
    tpu.vector_store %arg8[%c0_68, %c0_69], %229 {strides = array<i32>} : memref<8x32xf32, #tpu.memory_space<vmem>>, vector<8x32xf32>,
    %c0_70 = arith.constant 0 : index
    %c0_71 = arith.constant 0 : index
    %235 = vector.load %arg9[%c0_70, %c0_71] : memref<8x32xf32, #tpu.memory_space<vmem>>, vector<8x32xf32>
    tpu.vector_store %arg9[%c0_70, %c0_71], %227 {strides = array<i32>} : memref<8x32xf32, #tpu.memory_space<vmem>>, vector<8x32xf32>,
    return
  }
  func.func @transform_0(%arg0: i32, %arg1: i32) -> (i32, i32, i32) {
    %c0_i32 = arith.constant 0 : i32
    %c0_i32_0 = arith.constant 0 : i32
    return %arg1, %arg0, %c0_i32 : i32, i32, i32
  }
  func.func @transform_1(%arg0: i32, %arg1: i32) -> (i32, i32) {
    %c0_i32 = arith.constant 0 : i32
    %c0_i32_0 = arith.constant 0 : i32
    %c0_i32_1 = arith.constant 0 : i32
    return %c0_i32, %c0_i32_0 : i32, i32
  }
  func.func @transform_2(%arg0: i32, %arg1: i32) -> (i32, i32) {
    %c0_i32 = arith.constant 0 : i32
    %c0_i32_0 = arith.constant 0 : i32
    %c0_i32_1 = arith.constant 0 : i32
    return %c0_i32, %c0_i32_0 : i32, i32
  }
  func.func @transform_3(%arg0: i32, %arg1: i32) -> (i32, i32) {
    %c0_i32 = arith.constant 0 : i32
    %c0_i32_0 = arith.constant 0 : i32
    %c0_i32_1 = arith.constant 0 : i32
    return %c0_i32, %c0_i32_0 : i32, i32
  }
  func.func @transform_4(%arg0: i32, %arg1: i32) -> (i32, i32, i32) {
    %c0_i32 = arith.constant 0 : i32
    %c0_i32_0 = arith.constant 0 : i32
    return %arg1, %arg0, %c0_i32 : i32, i32, i32
  }
}

</mosaic_0001>

<bundles_post_ra>
// kernel: tpu_custom_call.1
= control target key start
LH: loop header
LB: loop body
LE: loop exit
PB: predicated region body
PF: predicated region fallthrough
CT: control target
= control target key end

     0   :  { %9 = vsyncpa [#allocation6], 0  ;;  %s1164_s0 = inlined_call_operand.hbm [shape: f32[8,8,16], index: 0, kind: input, shape index: {}]   ;;  %s1165_s1 = inlined_call_operand.hbm [shape: f32[16,128], index: 1, kind: input, shape index: {}]   ;;  %s1166_s2 = inlined_call_operand.vmem [shape: f32[1,128], index: 2, kind: input, shape index: {}]   ;;  %s1167_s3 = inlined_call_operand.hbm [shape: f32[32,128], index: 3, kind: input, shape index: {}]   ;;  %s1168_s4 = inlined_call_operand.hbm [shape: f32[8,8,32], index: 4, kind: output, shape index: {}]  }
   0x1   :  { %10 = vsyncpa [#allocation9], 0 }
   0x2   :  { %11 = vsyncpa [#allocation7], 0  ;;  %s29_s17 = sshll.u32 %s1165_s1, 4  ;;  %s952_s18 = smov [#allocation8]   ;;  %s30_s17 = int_to_ptr.hbm [resolvable:$true] %s29_s17 }
   0x3   :  { %s31_s19 = sshll.u32 %s952_s18, 4  ;;  %s16_s22 = sshll.u32 %s1164_s0, 4  ;;  %s32_s19 = int_to_ptr.vmem [resolvable:$true] %s31_s19  ;;  %s17_s22 = int_to_ptr.hbm [resolvable:$true] %s16_s22 }
   0x4   :  { %s953_s23 = smov 128   ;;  %s954_s24 = smov 8  }
   0x5   :  { %37 = dma.hbm_to_vmem [thread:$0]  %s30_s17, 256, %s32_s19, [#allocation9], %s953_s23, %s953_s23, %s954_s24  }
   0x6   :  { %s955_s25 = smov [#allocation5]   ;;  %s44_s1 = sshll.u32 %s1167_s3, 4  ;;  %s45_s1 = int_to_ptr.hbm [resolvable:$true] %s44_s1 }
   0x7   :  { %s18_s26 = sshll.u32 %s955_s25, 4  ;;  %s956_s0 = smov [#allocation10]   ;;  %s19_s26 = int_to_ptr.vmem [resolvable:$true] %s18_s26 }
   0x8   :  { %24 = dma.hbm_to_vmem [thread:$0]  %s17_s22, 1024, %s19_s26, [#allocation6], %s953_s23, %s953_s23, %s954_s24  }
   0x9   :  { %s46_s29 = sshll.u32 %s956_s0, 4  ;;  %s47_s29 = int_to_ptr.vmem [resolvable:$true] %s46_s29 }
   0xa   :  { %52 = dma.hbm_to_vmem [thread:$0]  %s45_s1, 512, %s47_s29, [#allocation9], %s953_s23, %s953_s23, %s954_s24  }
   0xb   :  { %946 = dma.done.wait [#allocation6], 1024  }
   0xc   :  { %947 = vsyncadd [#allocation6], 4294966272 }
   0xd   :  { %948 = dma.done.wait [#allocation9], 768  }
   0xe   :  { %949 = vsyncadd [#allocation9], 4294966528  ;;  %vm69_vm0 = vcmask 261120   ;;  %v957_v0 = vmov 0.0   ;;  %v1008_v1 = vld [vmem:[#allocation10 + $0x18] sm:$0xff]  ;;  %v1010_v3 = vld [vmem:[#allocation10 + $0x10] sm:$0xff]  ;;  %v160_v9 = vlaneseq }
   0xf   :  { %70 = vst.msk [vmem:[#allocation3] sm:$0xff] %vm69_vm0, %v957_v0  ;;  %v81_v2 = vld [vmem:[#allocation8 + $0x8] sm:$0xff]  ;;  %190 = vmatpush.msra.mxu1 %v1008_v1  ;;  %v80_v4 = vld [vmem:[#allocation8] sm:$0xff]  ;;  %vm86_vm1 = vcmask 130048   ;;  %v1013_v6 = vld [vmem:[#allocation10 + $0x8] sm:$0xff]  ;;  %263 = vmatpush.msra.mxu2 %v1008_v1  ;;  %v958_v14 = vmov 1.0  }
  0x10   :  { %71 = vst.msk [vmem:[#allocation4] sm:$0xff] %vm69_vm0, %v957_v0  ;;  %125 = vmatpush.msra.mxu0 %v81_v2  ;;  %v72_v5 = vld [vmem:[#allocation5] sm:$0xff]  ;;  %788 = vmatpush.msra.mxu3 %v81_v2  ;;  %v1018_v7 = vld [vmem:[#allocation10] sm:$0xff]  ;;  %v161_v10 = vand.u32 127, %v160_v9  ;;  %s960_s5 = smov 32   ;;  %v73_v45 = vld [vmem:[#allocation5 + $0x8] sm:$0xff] }
  0x11   :  { %191 = vmatpush.msra.mxu1 %v1010_v3  ;;  %264 = vmatpush.msra.mxu2 %v1010_v3  ;;  %v1045_v11 = vld [vmem:[%s1166_s2] ss:$0 sm:$0xff]  ;;  %s959_s2 = smov 64   ;;  %s961_s6 = smov 96  }
  0x12   :  { %126 = vmatpush.msra.mxu0 %v80_v4  ;;  %789 = vmatpush.msra.mxu3 %v80_v4  ;;  %vm162_vm2 = vcmp.ge.s32.totalorder %v161_v10, 64  ;;  %vm163_vm3 = vcmp.lt.s32.totalorder %v161_v10, 96  ;;  %s962_s7 = smov [#allocation11]   ;;  %s749_s11 = sshll.u32 %s1168_s4, 4  ;;  %s750_s11 = int_to_ptr.hbm [resolvable:$true] %s749_s11 }
  0x13   :  { %763 = vmatmul.msk.f32.vlgmr.msra.gmra.mxu0 %vm86_vm1, %v72_v5  ;;  %192 = vmatpush.msra.mxu1 %v1013_v6  ;;  %vm164_vm4 = vmand %vm162_vm2, %vm163_vm3  ;;  %s747_s8 = sshll.u32 %s962_s7, 4  ;;  %s748_s8 = int_to_ptr.vmem [resolvable:$true] %s747_s8 }
  0x14   :  { %265 = vmatpush.msra.mxu2 %v1013_v6  ;;  %333 = vmatpush.msrb.mxu3 %v1008_v1  ;;  %v1048_v15 = vsel %vm164_vm4, 2.0, %v958_v14  ;;  %v77_v14 = vld [vmem:[#allocation5 + $0x28] sm:$0xff] }
  0x15   :  { %193 = vmatpush.msra.mxu1 %v1018_v7  ;;  %v1052_v30 = vadd.f32 -1.0, %v1048_v15  ;;  %768 = vmatmul.msk.f32.vlgmr.msra.gmra.mxu3 %vm86_vm1, %v77_v14 }
  0x16   :  { %v171_v8 = vld [vmem:[#allocation3] sm:$0xff]  ;;  %266 = vmatpush.msra.mxu2 %v1018_v7  ;;  %334 = vmatpush.msrb.mxu3 %v1010_v3 }
  0x17   :  { %772 = vmatmul.msk.f32.vlgmr.msra.gmra.mxu1 %vm69_vm0, %v171_v8  ;;  %v172_v35 = vld [vmem:[#allocation4] sm:$0xff] }
  0x18   :  { %403 = vmatpush.msrb.mxu1 %v1008_v1  ;;  %473 = vmatpush.msrb.mxu2 %v1008_v1 }
  0x19   :  { %335 = vmatpush.msrb.mxu3 %v1013_v6 }
  0x1a   :  { %404 = vmatpush.msrb.mxu1 %v1010_v3  ;;  %474 = vmatpush.msrb.mxu2 %v1010_v3 }
  0x1b   :  { %336 = vmatpush.msrb.mxu3 %v1018_v7  ;;  %764 = vmatmul.msk.f32.gmra.mxu0 %vm86_vm1, %v73_v45 }
  0x1c   :  { %405 = vmatpush.msrb.mxu1 %v1013_v6  ;;  %475 = vmatpush.msrb.mxu2 %v1013_v6 }
  0x1d   :  { %543 = vmatpush.msra.mxu3 %v1008_v1 }
  0x1e   :  { %406 = vmatpush.msrb.mxu1 %v1018_v7  ;;  %476 = vmatpush.msrb.mxu2 %v1018_v7 }
  0x1f   :  { %544 = vmatpush.msra.mxu3 %v1010_v3 }
  0x20   :  { %613 = vmatpush.msra.mxu1 %v1008_v1 }
  0x21   :  { %545 = vmatpush.msra.mxu3 %v1013_v6 }
  0x22   :  { %614 = vmatpush.msra.mxu1 %v1010_v3 }
  0x23   :  { %546 = vmatpush.msra.mxu3 %v1018_v7 }
  0x24   :  { %615 = vmatpush.msra.mxu1 %v1013_v6 }
  0x26   :  { %616 = vmatpush.msra.mxu1 %v1018_v7 }
  0x90   :  { %v128_v12 = vpop.f32.mrf.mxu0 }
  0x91   :  { %v129_v13 = vadd.f32 %v1045_v11, %v128_v12 }
  0x94   :  { %v195_v16 = vpop.f32.mrf.mxu1 }
  0x95   :  { %v198_v17 = vadd.f32 %v195_v16, %v129_v13  ;;  %v78_v16 = vld [vmem:[#allocation5 + $0x30] sm:$0xff] }
  0x96   :  { %769 = vmatmul.msk.f32.gmra.mxu3 %vm86_vm1, %v78_v16 }
  0x97   :  { %v199_v18 = vmul.f32 %v198_v17, %v1048_v15  ;;  %v79_v17 = vld [vmem:[#allocation5 + $0x38] sm:$0xff] }
  0x98   :  { %v131_v47 = vpop.f32.mrf.mxu0 }
  0x99   :  { %v773_v19 = vmul.f32 -1.442695, %v199_v18  ;;  %v132_v48 = vadd.f32 %v1045_v11, %v131_v47 }
  0x9b   :  { %802 = vpow2.f32 %v773_v19 }
  0x9e   :  { %770 = vmatmul.msk.f32.gmra.mxu3 %vm86_vm1, %v79_v17 }
  0xa1   :  { %v803_v20 = vpop.eup %802 }
  0xa2   :  { %v203_v21 = vadd.f32 1.0, %v803_v20  ;;  %v74_v20 = vld [vmem:[#allocation5 + $0x10] sm:$0xff] }
  0xa3   :  { %765 = vmatmul.msk.f32.gmra.mxu0 %vm86_vm1, %v74_v20 }
  0xa4   :  { %804 = vrcp.f32 %v203_v21  ;;  %v215_v25 = vand.u32 2147483648, %v203_v21  ;;  %v213_v27 = vand.u32 2147483647, %v203_v21  ;;  %vm209_vm6 = vweird.f32 %v203_v21 }
  0xa6   :  { %v216_v29 = vor.u32 1.1754944e-38, %v215_v25  ;;  %vm214_vm8 = vcmp.eq.f32.partialorder %v213_v27, 8.507059e+37 }
  0xaa   :  { %v805_v22 = vpop.eup %804 }
  0xab   :  { %v205_v23 = vmul.f32 %v805_v22, %v203_v21  ;;  %vm210_vm5 = vweird.f32 %v805_v22 }
  0xac   :  { %vm211_vm7 = vmor %vm209_vm6, %vm210_vm5 }
  0xad   :  { %v206_v24 = vsub.f32 1.0, %v205_v23 }
  0xaf   :  { %v207_v26 = vmul.f32 %v805_v22, %v206_v24 }
  0xb1   :  { %v208_v28 = vadd.f32 %v805_v22, %v207_v26 }
  0xb3   :  { %v212_v31 = vsel %vm211_vm7, %v805_v22, %v208_v28 }
  0xb4   :  { %v217_v32 = vsel %vm214_vm8, %v216_v29, %v212_v31 }
  0xb5   :  { %v219_v33 = vmul.f32 %v217_v32, %v1048_v15 }
  0xb7   :  { %v220_v34 = vsub.f32 %v219_v33, %v1052_v30 }
  0xb9   :  { %227 = vrot.lane.b32.xlu0 %v220_v34, %s959_s2 }
  0xc1   :  { %222 = vrot.lane.b32.xlu0 %v172_v35, %s960_s5 }
 0x120   :  { %v134_v21 = vpop.f32.mrf.mxu0 }
 0x121   :  { %v135_v22 = vadd.f32 %v1045_v11, %v134_v21  ;;  %v76_v21 = vld [vmem:[#allocation5 + $0x20] sm:$0xff] }
 0x12b   :  { %v228_v36 = vpop.permute.xlu0 %227 }
 0x12c   :  { %v230_v37 = vmul.f32 %v228_v36, %v220_v34 }
 0x12e   :  { %232 = vrot.lane.b32.xlu1 %v230_v37, %s960_s5 }
 0x133   :  { %v223_v38 = vpop.permute.xlu0 %222 }
 0x134   :  { %v225_v39 = vmul.f32 %v223_v38, %v220_v34 }
 0x1a0   :  { %v233_v40 = vpop.permute.xlu1 %232 }
 0x1a1   :  { %v235_v41 = vadd.f32 %v233_v40, %v225_v39 }
 0x1a3   :  { %806 = vtanh.f32 %v235_v41 }
 0x1a9   :  { %v807_v42 = vpop.eup %806 }
 0x1aa   :  { %238 = vrot.lane.b32.xlu1 %v807_v42, %s959_s2 }
 0x21c   :  { %v239_v43 = vpop.permute.xlu1 %238 }
 0x21d   :  { %v241_v44 = vmul.f32 %v239_v43, %v220_v34 }
 0x21f   :  { %243 = vrot.lane.b32.xlu2 %v241_v44, %s960_s5 }
 0x279   :  { %v244_v46 = vpop.permute.xlu2 %243 }
 0x27a   :  { %246 = vst.msk [vmem:[#allocation11] sm:$0xff] %vm69_vm0, %v244_v46  ;;  %774 = vmatmul.msk.f32.vlgmr.msra.gmra.mxu2 %vm69_vm0, %v244_v46 }
 0x27b   :  { %683 = vmatpush.msra.mxu2 %v1008_v1 }
 0x27d   :  { %684 = vmatpush.msra.mxu2 %v1010_v3  ;;  %v1086_v3 = vpop.f32.mrf.mxu3 }
 0x27f   :  { %685 = vmatpush.msra.mxu2 %v1013_v6 }
 0x281   :  { %686 = vmatpush.msra.mxu2 %v1018_v7 }
 0x285   :  { %v1088_v6 = vpop.f32.mrf.mxu3 }
 0x28d   :  { %v1090_v7 = vpop.f32.mrf.mxu3 }
 0x2fd   :  { %v268_v49 = vpop.f32.mrf.mxu2 }
 0x2fe   :  { %v271_v50 = vadd.f32 %v268_v49, %v132_v48  ;;  %v75_v48 = vld [vmem:[#allocation5 + $0x18] sm:$0xff] }
 0x2ff   :  { %766 = vmatmul.msk.f32.gmra.mxu0 %vm86_vm1, %v75_v48 }
 0x300   :  { %v272_v51 = vmul.f32 %v271_v50, %v1048_v15 }
 0x302   :  { %v775_v52 = vmul.f32 -1.442695, %v272_v51 }
 0x304   :  { %808 = vpow2.f32 %v775_v52 }
 0x307   :  { %767 = vmatmul.msk.f32.gmra.mxu0 %vm86_vm1, %v76_v21  ;;  %v147_v21 = vadd.f32 %v1045_v11, %v1088_v6 }
 0x30a   :  { %v809_v53 = vpop.eup %808 }
 0x30b   :  { %v276_v54 = vadd.f32 1.0, %v809_v53 }
 0x30d   :  { %810 = vrcp.f32 %v276_v54  ;;  %v288_v58 = vand.u32 2147483648, %v276_v54  ;;  %v286_v60 = vand.u32 2147483647, %v276_v54  ;;  %vm282_vm10 = vweird.f32 %v276_v54 }
 0x30f   :  { %v289_v62 = vor.u32 1.1754944e-38, %v288_v58  ;;  %vm287_vm12 = vcmp.eq.f32.partialorder %v286_v60, 8.507059e+37 }
 0x313   :  { %v811_v55 = vpop.eup %810 }
 0x314   :  { %v278_v56 = vmul.f32 %v811_v55, %v276_v54  ;;  %vm283_vm9 = vweird.f32 %v811_v55 }
 0x315   :  { %vm284_vm11 = vmor %vm282_vm10, %vm283_vm9 }
 0x316   :  { %v279_v57 = vsub.f32 1.0, %v278_v56 }
 0x318   :  { %v280_v59 = vmul.f32 %v811_v55, %v279_v57 }
 0x31a   :  { %v281_v61 = vadd.f32 %v811_v55, %v280_v59 }
 0x31c   :  { %v285_v63 = vsel %vm284_vm11, %v811_v55, %v281_v61 }
 0x31d   :  { %v290_v0 = vsel %vm287_vm12, %v289_v62, %v285_v63 }
 0x31e   :  { %v292_v2 = vmul.f32 %v290_v0, %v1048_v15 }
 0x320   :  { %v293_v4 = vsub.f32 %v292_v2, %v1052_v30 }
 0x322   :  { %296 = vrot.lane.b32.xlu2 %v293_v4, %s959_s2  ;;  %v294_v9 = vmul.f32 %v293_v4, %v235_v41 }
 0x37c   :  { %v297_v5 = vpop.permute.xlu2 %296  ;;  %v137_v52 = vpop.f32.mrf.mxu0 }
 0x37d   :  { %v299_v8 = vmul.f32 %v297_v5, %v293_v4  ;;  %v138_v53 = vadd.f32 %v1045_v11, %v137_v52 }
 0x37f   :  { %301 = vrot.lane.b32.xlu0 %v299_v8, %s960_s5 }
 0x3f1   :  { %v302_v10 = vpop.permute.xlu0 %301 }
 0x3f2   :  { %v304_v12 = vadd.f32 %v302_v10, %v294_v9 }
 0x3f4   :  { %812 = vtanh.f32 %v304_v12 }
 0x3fa   :  { %v813_v13 = vpop.eup %812 }
 0x3fb   :  { %307 = vrot.lane.b32.xlu1 %v813_v13, %s959_s2 }
 0x46d   :  { %v308_v18 = vpop.permute.xlu1 %307 }
 0x46e   :  { %v310_v19 = vmul.f32 %v308_v18, %v293_v4 }
 0x470   :  { %312 = vrot.lane.b32.xlu2 %v310_v19, %s960_s5 }
 0x4ca   :  { %v313_v1 = vpop.permute.xlu2 %312 }
 0x4cb   :  { %316 = vst.msk [vmem:[#allocation11 + $0x8] sm:$0xff] %vm69_vm0, %v313_v1  ;;  %776 = vmatmul.msk.f32.vlgmr.msrb.gmra.mxu3 %vm69_vm0, %v313_v1 }
 0x54e   :  { %v338_v23 = vpop.f32.mrf.mxu3 }
 0x54f   :  { %v341_v24 = vadd.f32 %v338_v23, %v135_v22  ;;  %v140_v23 = vpop.f32.mrf.mxu0 }
 0x551   :  { %v342_v25 = vmul.f32 %v341_v24, %v1048_v15  ;;  %v141_v24 = vadd.f32 %v1045_v11, %v140_v23 }
 0x553   :  { %v777_v26 = vmul.f32 -1.442695, %v342_v25 }
 0x555   :  { %814 = vpow2.f32 %v777_v26 }
 0x55b   :  { %v815_v27 = vpop.eup %814 }
 0x55c   :  { %v346_v28 = vadd.f32 1.0, %v815_v27 }
 0x55e   :  { %816 = vrcp.f32 %v346_v28  ;;  %v358_v33 = vand.u32 2147483648, %v346_v28  ;;  %v356_v35 = vand.u32 2147483647, %v346_v28  ;;  %vm352_vm14 = vweird.f32 %v346_v28 }
 0x560   :  { %v359_v37 = vor.u32 1.1754944e-38, %v358_v33  ;;  %vm357_vm2 = vcmp.eq.f32.partialorder %v356_v35, 8.507059e+37 }
 0x564   :  { %v817_v29 = vpop.eup %816 }
 0x565   :  { %v348_v31 = vmul.f32 %v817_v29, %v346_v28  ;;  %vm353_vm13 = vweird.f32 %v817_v29 }
 0x566   :  { %vm354_vm15 = vmor %vm352_vm14, %vm353_vm13 }
 0x567   :  { %v349_v32 = vsub.f32 1.0, %v348_v31 }
 0x569   :  { %v350_v34 = vmul.f32 %v817_v29, %v349_v32 }
 0x56b   :  { %v351_v36 = vadd.f32 %v817_v29, %v350_v34 }
 0x56d   :  { %v355_v38 = vsel %vm354_vm15, %v817_v29, %v351_v36 }
 0x56e   :  { %v360_v39 = vsel %vm357_vm2, %v359_v37, %v355_v38 }
 0x56f   :  { %v362_v40 = vmul.f32 %v360_v39, %v1048_v15 }
 0x571   :  { %v363_v41 = vsub.f32 %v362_v40, %v1052_v30 }
 0x573   :  { %366 = vrot.lane.b32.xlu0 %v363_v41, %s959_s2  ;;  %v364_v44 = vmul.f32 %v363_v41, %v304_v12 }
 0x5e5   :  { %v367_v42 = vpop.permute.xlu0 %366 }
 0x5e6   :  { %v369_v43 = vmul.f32 %v367_v42, %v363_v41 }
 0x5e8   :  { %371 = vrot.lane.b32.xlu1 %v369_v43, %s960_s5 }
 0x65a   :  { %v372_v45 = vpop.permute.xlu1 %371 }
 0x65b   :  { %v374_v46 = vadd.f32 %v372_v45, %v364_v44 }
 0x65d   :  { %818 = vtanh.f32 %v374_v46 }
 0x663   :  { %v819_v47 = vpop.eup %818 }
 0x664   :  { %377 = vrot.lane.b32.xlu2 %v819_v47, %s959_s2 }
 0x6be   :  { %v378_v49 = vpop.permute.xlu2 %377 }
 0x6bf   :  { %v380_v50 = vmul.f32 %v378_v49, %v363_v41 }
 0x6c1   :  { %382 = vrot.lane.b32.xlu0 %v380_v50, %s960_s5 }
 0x733   :  { %v383_v51 = vpop.permute.xlu0 %382 }
 0x734   :  { %386 = vst.msk [vmem:[#allocation11 + $0x10] sm:$0xff] %vm69_vm0, %v383_v51  ;;  %778 = vmatmul.msk.f32.vlgmr.msrb.gmra.mxu1 %vm69_vm0, %v383_v51 }
 0x7b1   :  { %v408_v54 = vpop.f32.mrf.mxu1 }
 0x7b2   :  { %v411_v55 = vadd.f32 %v408_v54, %v138_v53  ;;  %v144_v53 = vadd.f32 %v1045_v11, %v1086_v3 }
 0x7b4   :  { %v412_v56 = vmul.f32 %v411_v55, %v1048_v15 }
 0x7b6   :  { %v779_v57 = vmul.f32 -1.442695, %v412_v56 }
 0x7b8   :  { %820 = vpow2.f32 %v779_v57 }
 0x7be   :  { %v821_v58 = vpop.eup %820 }
 0x7bf   :  { %v416_v59 = vadd.f32 1.0, %v821_v58 }
 0x7c1   :  { %822 = vrcp.f32 %v416_v59  ;;  %v428_v63 = vand.u32 2147483648, %v416_v59  ;;  %v426_v2 = vand.u32 2147483647, %v416_v59  ;;  %vm422_vm4 = vweird.f32 %v416_v59 }
 0x7c3   :  { %v429_v5 = vor.u32 1.1754944e-38, %v428_v63  ;;  %vm427_vm6 = vcmp.eq.f32.partialorder %v426_v2, 8.507059e+37 }
 0x7c7   :  { %v823_v60 = vpop.eup %822 }
 0x7c8   :  { %v418_v61 = vmul.f32 %v823_v60, %v416_v59  ;;  %vm423_vm3 = vweird.f32 %v823_v60 }
 0x7c9   :  { %vm424_vm5 = vmor %vm422_vm4, %vm423_vm3 }
 0x7ca   :  { %v419_v62 = vsub.f32 1.0, %v418_v61 }
 0x7cc   :  { %v420_v0 = vmul.f32 %v823_v60, %v419_v62 }
 0x7ce   :  { %v421_v4 = vadd.f32 %v823_v60, %v420_v0 }
 0x7d0   :  { %v425_v8 = vsel %vm424_vm5, %v823_v60, %v421_v4 }
 0x7d1   :  { %v430_v9 = vsel %vm427_vm6, %v429_v5, %v425_v8 }
 0x7d2   :  { %v432_v10 = vmul.f32 %v430_v9, %v1048_v15 }
 0x7d4   :  { %v433_v12 = vsub.f32 %v432_v10, %v1052_v30 }
 0x7d6   :  { %436 = vrot.lane.b32.xlu1 %v433_v12, %s959_s2  ;;  %v434_v16 = vmul.f32 %v433_v12, %v374_v46 }
 0x848   :  { %v437_v13 = vpop.permute.xlu1 %436 }
 0x849   :  { %v439_v14 = vmul.f32 %v437_v13, %v433_v12 }
 0x84b   :  { %441 = vrot.lane.b32.xlu2 %v439_v14, %s960_s5 }
 0x8a5   :  { %v442_v17 = vpop.permute.xlu2 %441 }
 0x8a6   :  { %v444_v18 = vadd.f32 %v442_v17, %v434_v16 }
 0x8a8   :  { %824 = vtanh.f32 %v444_v18 }
 0x8ae   :  { %v825_v19 = vpop.eup %824 }
 0x8af   :  { %447 = vrot.lane.b32.xlu0 %v825_v19, %s959_s2 }
 0x921   :  { %v448_v20 = vpop.permute.xlu0 %447 }
 0x922   :  { %v450_v1 = vmul.f32 %v448_v20, %v433_v12 }
 0x924   :  { %452 = vrot.lane.b32.xlu1 %v450_v1, %s960_s5 }
 0x996   :  { %v453_v22 = vpop.permute.xlu1 %452 }
 0x997   :  { %456 = vst.msk [vmem:[#allocation11 + $0x18] sm:$0xff] %vm69_vm0, %v453_v22  ;;  %780 = vmatmul.msk.f32.vlgmr.msrb.gmra.mxu2 %vm69_vm0, %v453_v22 }
 0xa1a   :  { %v478_v25 = vpop.f32.mrf.mxu2 }
 0xa1b   :  { %v481_v26 = vadd.f32 %v478_v25, %v141_v24 }
 0xa1d   :  { %v482_v27 = vmul.f32 %v481_v26, %v1048_v15 }
 0xa1f   :  { %v781_v28 = vmul.f32 -1.442695, %v482_v27 }
 0xa21   :  { %826 = vpow2.f32 %v781_v28 }
 0xa27   :  { %v827_v29 = vpop.eup %826 }
 0xa28   :  { %v486_v31 = vadd.f32 1.0, %v827_v29 }
 0xa2a   :  { %828 = vrcp.f32 %v486_v31  ;;  %v498_v35 = vand.u32 2147483648, %v486_v31  ;;  %v496_v37 = vand.u32 2147483647, %v486_v31  ;;  %vm492_vm7 = vweird.f32 %v486_v31 }
 0xa2c   :  { %v499_v39 = vor.u32 1.1754944e-38, %v498_v35  ;;  %vm497_vm9 = vcmp.eq.f32.partialorder %v496_v37, 8.507059e+37 }
 0xa30   :  { %v829_v32 = vpop.eup %828 }
 0xa31   :  { %v488_v33 = vmul.f32 %v829_v32, %v486_v31  ;;  %vm493_vm1 = vweird.f32 %v829_v32 }
 0xa32   :  { %vm494_vm8 = vmor %vm492_vm7, %vm493_vm1 }
 0xa33   :  { %v489_v34 = vsub.f32 1.0, %v488_v33 }
 0xa35   :  { %v490_v36 = vmul.f32 %v829_v32, %v489_v34 }
 0xa37   :  { %v491_v38 = vadd.f32 %v829_v32, %v490_v36 }
 0xa39   :  { %v495_v40 = vsel %vm494_vm8, %v829_v32, %v491_v38 }
 0xa3a   :  { %v500_v41 = vsel %vm497_vm9, %v499_v39, %v495_v40 }
 0xa3b   :  { %v502_v42 = vmul.f32 %v500_v41, %v1048_v15 }
 0xa3d   :  { %v503_v43 = vsub.f32 %v502_v42, %v1052_v30 }
 0xa3f   :  { %506 = vrot.lane.b32.xlu2 %v503_v43, %s959_s2  ;;  %v504_v46 = vmul.f32 %v503_v43, %v444_v18 }
 0xa99   :  { %v507_v44 = vpop.permute.xlu2 %506 }
 0xa9a   :  { %v509_v45 = vmul.f32 %v507_v44, %v503_v43 }
 0xa9c   :  { %511 = vrot.lane.b32.xlu0 %v509_v45, %s960_s5 }
 0xb0e   :  { %v512_v47 = vpop.permute.xlu0 %511 }
 0xb0f   :  { %v514_v48 = vadd.f32 %v512_v47, %v504_v46 }
 0xb11   :  { %830 = vtanh.f32 %v514_v48 }
 0xb17   :  { %v831_v49 = vpop.eup %830 }
 0xb18   :  { %517 = vrot.lane.b32.xlu1 %v831_v49, %s959_s2  ;;  %v150_v49 = vadd.f32 %v1045_v11, %v1090_v7 }
 0xb8a   :  { %v518_v50 = vpop.permute.xlu1 %517 }
 0xb8b   :  { %v520_v51 = vmul.f32 %v518_v50, %v503_v43 }
 0xb8d   :  { %522 = vrot.lane.b32.xlu2 %v520_v51, %s960_s5 }
 0xbe7   :  { %v523_v52 = vpop.permute.xlu2 %522 }
 0xbe8   :  { %526 = vst.msk [vmem:[#allocation11 + $0x20] sm:$0xff] %vm69_vm0, %v523_v52  ;;  %782 = vmatmul.msk.f32.vlgmr.msra.gmra.mxu3 %vm69_vm0, %v523_v52 }
 0xc6b   :  { %v548_v54 = vpop.f32.mrf.mxu3 }
 0xc6c   :  { %v551_v55 = vadd.f32 %v548_v54, %v144_v53 }
 0xc6e   :  { %v552_v56 = vmul.f32 %v551_v55, %v1048_v15 }
 0xc70   :  { %v783_v57 = vmul.f32 -1.442695, %v552_v56 }
 0xc72   :  { %832 = vpow2.f32 %v783_v57 }
 0xc78   :  { %v833_v58 = vpop.eup %832 }
 0xc79   :  { %v556_v59 = vadd.f32 1.0, %v833_v58 }
 0xc7b   :  { %834 = vrcp.f32 %v556_v59  ;;  %v568_v63 = vand.u32 2147483648, %v556_v59  ;;  %v566_v2 = vand.u32 2147483647, %v556_v59  ;;  %vm562_vm11 = vweird.f32 %v556_v59 }
 0xc7d   :  { %v569_v3 = vor.u32 1.1754944e-38, %v568_v63  ;;  %vm567_vm13 = vcmp.eq.f32.partialorder %v566_v2, 8.507059e+37 }
 0xc81   :  { %v835_v60 = vpop.eup %834 }
 0xc82   :  { %v558_v61 = vmul.f32 %v835_v60, %v556_v59  ;;  %vm563_vm10 = vweird.f32 %v835_v60 }
 0xc83   :  { %vm564_vm12 = vmor %vm562_vm11, %vm563_vm10 }
 0xc84   :  { %v559_v62 = vsub.f32 1.0, %v558_v61 }
 0xc86   :  { %v560_v0 = vmul.f32 %v835_v60, %v559_v62 }
 0xc88   :  { %v561_v4 = vadd.f32 %v835_v60, %v560_v0 }
 0xc8a   :  { %v565_v5 = vsel %vm564_vm12, %v835_v60, %v561_v4 }
 0xc8b   :  { %v570_v8 = vsel %vm567_vm13, %v569_v3, %v565_v5 }
 0xc8c   :  { %v572_v9 = vmul.f32 %v570_v8, %v1048_v15 }
 0xc8e   :  { %v573_v10 = vsub.f32 %v572_v9, %v1052_v30 }
 0xc90   :  { %576 = vrot.lane.b32.xlu0 %v573_v10, %s959_s2  ;;  %v574_v14 = vmul.f32 %v573_v10, %v514_v48 }
 0xd02   :  { %v577_v12 = vpop.permute.xlu0 %576 }
 0xd03   :  { %v579_v13 = vmul.f32 %v577_v12, %v573_v10 }
 0xd05   :  { %581 = vrot.lane.b32.xlu1 %v579_v13, %s960_s5 }
 0xd77   :  { %v582_v16 = vpop.permute.xlu1 %581 }
 0xd78   :  { %v584_v17 = vadd.f32 %v582_v16, %v574_v14 }
 0xd7a   :  { %836 = vtanh.f32 %v584_v17 }
 0xd80   :  { %v837_v18 = vpop.eup %836 }
 0xd81   :  { %587 = vrot.lane.b32.xlu2 %v837_v18, %s959_s2 }
 0xddb   :  { %v588_v19 = vpop.permute.xlu2 %587 }
 0xddc   :  { %v590_v20 = vmul.f32 %v588_v19, %v573_v10 }
 0xdde   :  { %592 = vrot.lane.b32.xlu0 %v590_v20, %s960_s5 }
 0xe50   :  { %v593_v1 = vpop.permute.xlu0 %592 }
 0xe51   :  { %596 = vst.msk [vmem:[#allocation11 + $0x28] sm:$0xff] %vm69_vm0, %v593_v1  ;;  %784 = vmatmul.msk.f32.vlgmr.msra.gmra.mxu1 %vm69_vm0, %v593_v1 }
 0xece   :  { %v618_v22 = vpop.f32.mrf.mxu1 }
 0xecf   :  { %v621_v23 = vadd.f32 %v618_v22, %v147_v21 }
 0xed1   :  { %v622_v24 = vmul.f32 %v621_v23, %v1048_v15 }
 0xed3   :  { %v785_v25 = vmul.f32 -1.442695, %v622_v24 }
 0xed5   :  { %838 = vpow2.f32 %v785_v25 }
 0xedb   :  { %v839_v26 = vpop.eup %838 }
 0xedc   :  { %v626_v27 = vadd.f32 1.0, %v839_v26 }
 0xede   :  { %840 = vrcp.f32 %v626_v27  ;;  %v638_v32 = vand.u32 2147483648, %v626_v27  ;;  %v636_v34 = vand.u32 2147483647, %v626_v27  ;;  %vm632_vm15 = vweird.f32 %v626_v27 }
 0xee0   :  { %v639_v6 = vor.u32 1.1754944e-38, %v638_v32  ;;  %vm637_vm3 = vcmp.eq.f32.partialorder %v636_v34, 8.507059e+37 }
 0xee4   :  { %v841_v28 = vpop.eup %840 }
 0xee5   :  { %v628_v29 = vmul.f32 %v841_v28, %v626_v27  ;;  %vm633_vm14 = vweird.f32 %v841_v28 }
 0xee6   :  { %vm634_vm2 = vmor %vm632_vm15, %vm633_vm14 }
 0xee7   :  { %v629_v31 = vsub.f32 1.0, %v628_v29 }
 0xee9   :  { %v630_v33 = vmul.f32 %v841_v28, %v629_v31 }
 0xeeb   :  { %v631_v35 = vadd.f32 %v841_v28, %v630_v33 }
 0xeed   :  { %v635_v36 = vsel %vm634_vm2, %v841_v28, %v631_v35 }
 0xeee   :  { %v640_v37 = vsel %vm637_vm3, %v639_v6, %v635_v36 }
 0xeef   :  { %v642_v38 = vmul.f32 %v640_v37, %v1048_v15 }
 0xef1   :  { %v643_v39 = vsub.f32 %v642_v38, %v1052_v30 }
 0xef3   :  { %646 = vrot.lane.b32.xlu1 %v643_v39, %s959_s2  ;;  %v644_v42 = vmul.f32 %v643_v39, %v584_v17 }
 0xf65   :  { %v647_v40 = vpop.permute.xlu1 %646 }
 0xf66   :  { %v649_v41 = vmul.f32 %v647_v40, %v643_v39 }
 0xf68   :  { %651 = vrot.lane.b32.xlu2 %v649_v41, %s960_s5 }
 0xfc2   :  { %v652_v43 = vpop.permute.xlu2 %651 }
 0xfc3   :  { %v654_v44 = vadd.f32 %v652_v43, %v644_v42 }
 0xfc5   :  { %842 = vtanh.f32 %v654_v44 }
 0xfcb   :  { %v843_v45 = vpop.eup %842 }
 0xfcc   :  { %657 = vrot.lane.b32.xlu0 %v843_v45, %s959_s2 }
0x103e   :  { %v658_v46 = vpop.permute.xlu0 %657 }
0x103f   :  { %v660_v47 = vmul.f32 %v658_v46, %v643_v39 }
0x1041   :  { %662 = vrot.lane.b32.xlu1 %v660_v47, %s960_s5 }
0x10b3   :  { %v663_v48 = vpop.permute.xlu1 %662 }
0x10b4   :  { %666 = vst.msk [vmem:[#allocation11 + $0x30] sm:$0xff] %vm69_vm0, %v663_v48  ;;  %786 = vmatmul.msk.f32.vlgmr.msra.gmra.mxu2 %vm69_vm0, %v663_v48 }
0x1137   :  { %v688_v50 = vpop.f32.mrf.mxu2 }
0x1138   :  { %v691_v51 = vadd.f32 %v688_v50, %v150_v49 }
0x113a   :  { %v692_v52 = vmul.f32 %v691_v51, %v1048_v15 }
0x113c   :  { %v787_v53 = vmul.f32 -1.442695, %v692_v52 }
0x113e   :  { %844 = vpow2.f32 %v787_v53 }
0x1144   :  { %v845_v54 = vpop.eup %844 }
0x1145   :  { %v696_v55 = vadd.f32 1.0, %v845_v54 }
0x1147   :  { %846 = vrcp.f32 %v696_v55  ;;  %v708_v59 = vand.u32 2147483648, %v696_v55  ;;  %v706_v61 = vand.u32 2147483647, %v696_v55  ;;  %vm702_vm5 = vweird.f32 %v696_v55 }
0x1149   :  { %v709_v11 = vor.u32 1.1754944e-38, %v708_v59  ;;  %vm707_vm1 = vcmp.eq.f32.partialorder %v706_v61, 8.507059e+37 }
0x114d   :  { %v847_v56 = vpop.eup %846 }
0x114e   :  { %v698_v57 = vmul.f32 %v847_v56, %v696_v55  ;;  %vm703_vm4 = vweird.f32 %v847_v56 }
0x114f   :  { %vm704_vm6 = vmor %vm702_vm5, %vm703_vm4 }
0x1150   :  { %v699_v58 = vsub.f32 1.0, %v698_v57 }
0x1152   :  { %v700_v60 = vmul.f32 %v847_v56, %v699_v58 }
0x1154   :  { %v701_v62 = vadd.f32 %v847_v56, %v700_v60 }
0x1156   :  { %v705_v7 = vsel %vm704_vm6, %v847_v56, %v701_v62 }
0x1157   :  { %v710_v63 = vsel %vm707_vm1, %v709_v11, %v705_v7 }
0x1158   :  { %v712_v0 = vmul.f32 %v710_v63, %v1048_v15 }
0x115a   :  { %v713_v2 = vsub.f32 %v712_v0, %v1052_v30 }
0x115c   :  { %716 = vrot.lane.b32.xlu2 %v713_v2, %s959_s2  ;;  %v714_v5 = vmul.f32 %v713_v2, %v654_v44 }
0x11b6   :  { %v717_v4 = vpop.permute.xlu2 %716 }
0x11b7   :  { %v719_v3 = vmul.f32 %v717_v4, %v713_v2 }
0x11b9   :  { %721 = vrot.lane.b32.xlu0 %v719_v3, %s960_s5 }
0x122b   :  { %v722_v8 = vpop.permute.xlu0 %721 }
0x122c   :  { %v724_v9 = vadd.f32 %v722_v8, %v714_v5 }
0x122e   :  { %848 = vtanh.f32 %v724_v9  ;;  %739 = vrot.lane.b32.xlu0 %v724_v9, %s961_s6 }
0x1234   :  { %v849_v10 = vpop.eup %848 }
0x1235   :  { %727 = vrot.lane.b32.xlu1 %v849_v10, %s959_s2 }
0x12a0   :  { %v740_v12 = vpop.permute.xlu0 %739 }
0x12a1   :  { %742 = vst.msk [vmem:[#allocation4] sm:$0xff] %vm69_vm0, %v740_v12 }
0x12a7   :  { %v728_v15 = vpop.permute.xlu1 %727 }
0x12a8   :  { %v730_v30 = vmul.f32 %v728_v15, %v713_v2 }
0x12aa   :  { %732 = vrot.lane.b32.xlu2 %v730_v30, %s960_s5 }
0x1304   :  { %v733_v13 = vpop.permute.xlu2 %732 }
0x1305   :  { %736 = vst.msk [vmem:[#allocation11 + $0x38] sm:$0xff] %vm69_vm0, %v733_v13 }
0x1306   :  { %737 = vst.msk [vmem:[#allocation3] sm:$0xff] %vm69_vm0, %v733_v13  ;;  %755 = dma.vmem_to_hbm [thread:$0]  %s748_s8, 1024, %s750_s11, [#allocation7], %s953_s23, %s953_s23, %s954_s24  }
0x1307   :  { %950 = dma.done.wait [#allocation7], 1024  }
0x1308   :  { %951 = vsyncadd [#allocation7], 4294966272 }
0x1309   :  { %760 = vsyncpa [#allocation6], 1 }
0x130a   :  { %761 = vsyncpa [#allocation9], 1 }
0x130b   :  { %762 = vsyncpa [#allocation7], 1 }

</bundles_post_ra>
